<compile_context>
chip_gen: v5e
topology: v5e:2x2
jax: 0.10.0
libtpu: 0.0.40
codegen_flags: <defaults>
</compile_context>

<pallas_src>
import functools
import numpy as np
import jax
import jax.numpy as jnp
from jax.experimental import pallas as pl
from jax.experimental.pallas import tpu as pltpu


# ----------------------------- Pallas kernels -------------------------------

def _mm_kernel(x_ref, w_ref, s_ref, b_ref, o_ref, *, relu6):
    """Fused matmul (bf16 MXU operands, f32 accumulate) + BN affine + ReLU6."""
    acc = jnp.dot(x_ref[...].astype(jnp.bfloat16), w_ref[...],
                  preferred_element_type=jnp.float32)
    acc = acc * s_ref[...] + b_ref[...]
    if relu6:
        acc = jnp.clip(acc, 0.0, 6.0)
    o_ref[...] = acc.astype(o_ref.dtype)


def matmul_bn_act(x2d, w2d, scale, bias, relu6, tile_m=256):
    """im2col / 1x1-conv as a tiled matmul with fused folded-BN + ReLU6."""
    M, K = x2d.shape
    C = w2d.shape[1]
    if M <= tile_m:
        tm, Mp = M, M
    else:
        tm = tile_m
        Mp = pl.cdiv(M, tm) * tm
        if Mp != M:                      # keep row blocks (8,128)-friendly
            x2d = jnp.pad(x2d, ((0, Mp - M), (0, 0)))
    y = pl.pallas_call(
        functools.partial(_mm_kernel, relu6=relu6),
        out_shape=jax.ShapeDtypeStruct((Mp, C), jnp.float32),
        grid=(Mp // tm,),
        in_specs=[
            pl.BlockSpec((tm, K), lambda i: (i, 0)),
            pl.BlockSpec((K, C), lambda i: (0, 0)),
            pl.BlockSpec((1, C), lambda i: (0, 0)),
            pl.BlockSpec((1, C), lambda i: (0, 0)),
        ],
        out_specs=pl.BlockSpec((tm, C), lambda i: (i, 0)),
        compiler_params=pltpu.CompilerParams(
            dimension_semantics=("parallel",)),
    )(x2d, w2d, scale.reshape(1, C), bias.reshape(1, C))
    return y[:M] if Mp != M else y


def _block_s1_kernel(*refs, has_expand, use_res):
    # Fused stride-1 inverted-residual block for one batch element:
    #   [expand 1x1 + BN + ReLU6] -> depthwise 3x3 (pad 1) + BN + ReLU6
    #   -> project 1x1 + BN [+ residual].
    # pad_ref is a zero-initialised VMEM scratch holding the padded depthwise
    # input: data lives at rows 1..H and (sublane-aligned) columns 8..W+7; the
    # surrounding zeros are the halo, so no jnp.pad / HBM round trip is needed.
    if has_expand:
        (x_ref, we_ref, se_ref, be_ref, wd_ref, sd_ref, bd_ref,
         wp_ref, sp_ref, bp_ref, o_ref, pad_ref) = refs
    else:
        (x_ref, wd_ref, sd_ref, bd_ref,
         wp_ref, sp_ref, bp_ref, o_ref, pad_ref) = refs

    _, H, W, _ = x_ref.shape
    x0 = x_ref[0]                                        # (H, W, Cin) f32
    pad_ref[...] = jnp.zeros_like(pad_ref)

    if has_expand:
        we = we_ref[...]                                 # (Cin, Chid) bf16
        se = se_ref[...]
        be = be_ref[...]
    for hh in range(H):
        row = x0[hh]                                     # (W, Cin)
        if has_expand:
            h = jnp.dot(row.astype(jnp.bfloat16), we,
                        preferred_element_type=jnp.float32)
            h = jnp.clip(h * se + be, 0.0, 6.0)
        else:
            h = row
        pad_ref[1 + hh, 8:8 + W, :] = h                  # aligned sublane window

    xs = pad_ref[...]                                    # (H+2, W+16, Chid)
    wd = wd_ref[...]                                     # (3, 3, Chid) f32
    Chid = xs.shape[-1]
    acc = jnp.zeros((H, W, Chid), jnp.float32)
    for dh in range(3):
        for dw in range(3):
            acc = acc + xs[dh:dh + H, 7 + dw:7 + dw + W, :] * wd[dh, dw, :]
    acc = jnp.clip(acc * sd_ref[...] + bd_ref[...], 0.0, 6.0)

    wp = wp_ref[...]                                     # (Chid, Cout) bf16
    sp = sp_ref[...]
    bp = bp_ref[...]
    for hh in range(H):
        r = jnp.dot(acc[hh].astype(jnp.bfloat16), wp,
                    preferred_element_type=jnp.float32)
        r = r * sp + bp
        if use_res:
            r = r + x0[hh]                               # fused residual add
        o_ref[0, hh] = r.astype(o_ref.dtype)


def _block_s1_1x1_kernel(*refs, has_expand, use_res):
    # At 1x1 spatial the 3x3 depthwise reduces to its centre tap (all other
    # taps read zero padding), so the whole block is per-pixel math over the
    # batch and runs as two MXU matmuls in a single kernel.
    if has_expand:
        (x_ref, we_ref, se_ref, be_ref, wd_ref, sd_ref, bd_ref,
         wp_ref, sp_ref, bp_ref, o_ref) = refs
    else:
        (x_ref, wd_ref, sd_ref, bd_ref, wp_ref, sp_ref, bp_ref, o_ref) = refs

    x2 = x_ref[...]                                      # (N, Cin) f32
    if has_expand:
        h = jnp.dot(x2.astype(jnp.bfloat16), we_ref[...],
                    preferred_element_type=jnp.float32)
        h = jnp.clip(h * se_ref[...] + be_ref[...], 0.0, 6.0)
    else:
        h = x2
    d = h * wd_ref[...][1, 1, :]                         # centre tap only
    d = jnp.clip(d * sd_ref[...] + bd_ref[...], 0.0, 6.0)
    r = jnp.dot(d.astype(jnp.bfloat16), wp_ref[...],
                preferred_element_type=jnp.float32)
    r = r * sp_ref[...] + bp_ref[...]
    if use_res:
        r = r + x2
    o_ref[...] = r.astype(o_ref.dtype)


def _dw_s2_kernel(x_ref, w_ref, s_ref, b_ref, o_ref, pad_ref):
    # Stride-2 depthwise 3x3 (pad 1) computed directly at output resolution.
    # x_ref holds the four 2x2 spatial phases of the input:
    #   x_ref[0, 2*p + q, i, j, c] == x[2*i + p, 2*j + q, c]
    # pad_ref is a zero-initialised scratch providing the top/left halo (each
    # phase lives at rows 1.. and sublane-aligned columns 8..).
    _, _, Ho, Wo, C = x_ref.shape
    pad_ref[...] = jnp.zeros_like(pad_ref)
    for k in range(4):
        pad_ref[k, 1:1 + Ho, 8:8 + Wo, :] = x_ref[0, k]
    xs = pad_ref[...]                                    # (4, Ho+1, Wo+8, C)
    w = w_ref[...]
    s = s_ref[...]
    b = b_ref[...]
    acc = jnp.zeros((Ho, Wo, C), jnp.float32)
    for dh in range(3):
        p = 0 if dh == 1 else 1           # source row 2i+dh-1 -> row parity
        rs = 0 if dh == 0 else 1          # and phase-row offset
        for dw in range(3):
            q = 0 if dw == 1 else 1
            cs = 0 if dw == 0 else 1
            acc = acc + (xs[2 * p + q, rs:rs + Ho, 7 + cs:7 + cs + Wo, :]
                         * w[dh, dw, :])
    acc = jnp.clip(acc * s + b, 0.0, 6.0)
    o_ref[0] = acc.astype(o_ref.dtype)


def _gap_kernel(x_ref, o_ref):
    # Global average pool over spatial dims for one batch element
    # (only used when the head feature map is larger than 1x1).
    o_ref[...] = jnp.mean(x_ref[0], axis=(0, 1)).reshape(1, 1, -1)


# ----------------------------- kernel wrappers -------------------------------

def fused_block_s1(x, blk):
    N, H, W, Cin = x.shape
    e, d, p = blk["expand"], blk["dw"], blk["project"]
    Chid = d["w"].shape[-1]
    Cout = p["w"].shape[-1]
    has_expand = e is not None
    use_res = blk["use_res"]

    dw_args = [d["w"], d["scale"].reshape(1, Chid), d["bias"].reshape(1, Chid)]
    dw_specs = [pl.BlockSpec((3, 3, Chid), lambda n: (0, 0, 0)),
                pl.BlockSpec((1, Chid), lambda n: (0, 0)),
                pl.BlockSpec((1, Chid), lambda n: (0, 0))]
    pr_args = [p["w"], p["scale"].reshape(1, Cout), p["bias"].reshape(1, Cout)]
    pr_specs = [pl.BlockSpec((Chid, Cout), lambda n: (0, 0)),
                pl.BlockSpec((1, Cout), lambda n: (0, 0)),
                pl.BlockSpec((1, Cout), lambda n: (0, 0))]
    ex_args, ex_specs = [], []
    if has_expand:
        ex_args = [e["w"], e["scale"].reshape(1, Chid),
                   e["bias"].reshape(1, Chid)]
        ex_specs = [pl.BlockSpec((Cin, Chid), lambda n: (0, 0)),
                    pl.BlockSpec((1, Chid), lambda n: (0, 0)),
                    pl.BlockSpec((1, Chid), lambda n: (0, 0))]

    if H == 1 and W == 1:
        y = pl.pallas_call(
            functools.partial(_block_s1_1x1_kernel,
                              has_expand=has_expand, use_res=use_res),
            out_shape=jax.ShapeDtypeStruct((N, Cout), jnp.float32),
            grid=(1,),
            in_specs=([pl.BlockSpec((N, Cin), lambda n: (0, 0))]
                      + ex_specs + dw_specs + pr_specs),
            out_specs=pl.BlockSpec((N, Cout), lambda n: (0, 0)),
            compiler_params=pltpu.CompilerParams(
                dimension_semantics=("arbitrary",)),
        )(x.reshape(N, Cin), *ex_args, *dw_args, *pr_args)
        return y.reshape(N, 1, 1, Cout)

    return pl.pallas_call(
        functools.partial(_block_s1_kernel,
                          has_expand=has_expand, use_res=use_res),
        out_shape=jax.ShapeDtypeStruct((N, H, W, Cout), jnp.float32),
        grid=(N,),
        in_specs=([pl.BlockSpec((1, H, W, Cin), lambda n: (n, 0, 0, 0))]
                  + ex_specs + dw_specs + pr_specs),
        out_specs=pl.BlockSpec((1, H, W, Cout), lambda n: (n, 0, 0, 0)),
        scratch_shapes=[pltpu.VMEM((H + 2, W + 16, Chid), jnp.float32)],
        compiler_params=pltpu.CompilerParams(
            dimension_semantics=("parallel",)),
    )(x, *ex_args, *dw_args, *pr_args)


def depthwise3x3_s2(x, d):
    N, H, W, C = x.shape
    Ho, Wo = H // 2, W // 2
    # 2x2 phase decomposition (single cheap reshape/transpose, no padded copy).
    xp = x.reshape(N, Ho, 2, Wo, 2, C).transpose(0, 2, 4, 1, 3, 5)
    xp = xp.reshape(N, 4, Ho, Wo, C)
    return pl.pallas_call(
        _dw_s2_kernel,
        out_shape=jax.ShapeDtypeStruct((N, Ho, Wo, C), jnp.float32),
        grid=(N,),
        in_specs=[
            pl.BlockSpec((1, 4, Ho, Wo, C), lambda n: (n, 0, 0, 0, 0)),
            pl.BlockSpec((3, 3, C), lambda n: (0, 0, 0)),
            pl.BlockSpec((1, C), lambda n: (0, 0)),
            pl.BlockSpec((1, C), lambda n: (0, 0)),
        ],
        out_specs=pl.BlockSpec((1, Ho, Wo, C), lambda n: (n, 0, 0, 0)),
        scratch_shapes=[pltpu.VMEM((4, Ho + 1, Wo + 8, C), jnp.float32)],
        compiler_params=pltpu.CompilerParams(
            dimension_semantics=("parallel",)),
    )(xp, d["w"], d["scale"].reshape(1, C), d["bias"].reshape(1, C))


def block_s2(x, blk):
    e, d, p = blk["expand"], blk["dw"], blk["project"]
    N, H, W, Cin = x.shape
    Chid = d["w"].shape[-1]
    Cout = p["w"].shape[-1]
    Ho, Wo = H // 2, W // 2
    h = matmul_bn_act(x.reshape(N * H * W, Cin), e["w"],
                      e["scale"], e["bias"], relu6=True)
    dwo = depthwise3x3_s2(h.reshape(N, H, W, Chid), d)
    y = matmul_bn_act(dwo.reshape(N * Ho * Wo, Chid), p["w"],
                      p["scale"], p["bias"], relu6=False)
    return y.reshape(N, Ho, Wo, Cout)


def global_avg_pool(x_nhwc):
    N, H, W, C = x_nhwc.shape
    y = pl.pallas_call(
        _gap_kernel,
        out_shape=jax.ShapeDtypeStruct((N, 1, C), jnp.float32),
        grid=(N,),
        in_specs=[pl.BlockSpec((1, H, W, C), lambda n: (n, 0, 0, 0))],
        out_specs=pl.BlockSpec((1, 1, C), lambda n: (n, 0, 0)),
        compiler_params=pltpu.CompilerParams(
            dimension_semantics=("parallel",)),
    )(x_nhwc)
    return y.reshape(N, C)


def stem_conv3x3_s2(x, p):
    # 3x3 stride-2 pad-1 conv via im2col on the tiny 3-channel input + fused
    # Pallas matmul.
    # TODO(synk): fold the im2col into the kernel for high-resolution inputs
    # (the 9x read amplification is negligible at 32x32).
    N, H, W, Cin = x.shape
    Ho, Wo = H // 2, W // 2
    xp = jnp.pad(x, ((0, 0), (1, 1), (1, 1), (0, 0)))
    patches = []
    for dh in range(3):
        for dw in range(3):
            patches.append(xp[:, dh:dh + 2 * Ho:2, dw:dw + 2 * Wo:2, :])
    xcol = jnp.concatenate(patches, axis=-1).reshape(N * Ho * Wo, 9 * Cin)
    Cout = p["w"].shape[-1]
    y2d = matmul_bn_act(xcol, p["w"], p["scale"], p["bias"], relu6=True)
    return y2d.reshape(N, Ho, Wo, Cout)


# ------------------------- parameter construction ---------------------------

_INVERTED_RESIDUAL_SETTINGS = [
    # t, c, n, s  (MobileNetV2, width_mult = 1.0)
    (1, 16, 1, 1),
    (6, 24, 2, 2),
    (6, 32, 3, 2),
    (6, 64, 4, 2),
    (6, 96, 3, 1),
    (6, 160, 3, 2),
    (6, 320, 1, 1),
]


def _conv_bn_params(key, kh, kw, cin, cout):
    # 1x1 / im2col conv weights stored 2D and in bf16 (MXU-native, halves DMA).
    k1, k2, k3 = jax.random.split(key, 3)
    fan_in = kh * kw * cin
    w = jax.random.normal(k1, (kh * kw * cin, cout), jnp.float32) / np.sqrt(fan_in)
    return dict(
        w=w.astype(jnp.bfloat16),
        scale=1.0 + 0.1 * jax.random.normal(k2, (cout,), jnp.float32),
        bias=0.05 * jax.random.normal(k3, (cout,), jnp.float32),
    )


def _dw_bn_params(key, c):
    # Depthwise weights stay f32 (VPU math in f32; v5e has no bf16 VALU).
    k1, k2, k3 = jax.random.split(key, 3)
    return dict(
        w=jax.random.normal(k1, (3, 3, c), jnp.float32) / 3.0,
        scale=1.0 + 0.1 * jax.random.normal(k2, (c,), jnp.float32),
        bias=0.05 * jax.random.normal(k3, (c,), jnp.float32),
    )


def init_feature_extractor_params(key):
    params = {"blocks": []}
    key, k0 = jax.random.split(key)
    params["stem"] = _conv_bn_params(k0, 3, 3, 3, 32)           # ConvBNReLU6 s=2
    cin = 32
    for t, c, n, s in _INVERTED_RESIDUAL_SETTINGS:
        for i in range(n):
            stride = s if i == 0 else 1
            hidden = cin * t
            key, ke, kd, kp = jax.random.split(key, 4)
            params["blocks"].append(dict(
                stride=stride,
                use_res=(stride == 1 and cin == c),
                expand=None if t == 1 else _conv_bn_params(ke, 1, 1, cin, hidden),
                dw=_dw_bn_params(kd, hidden),
                project=_conv_bn_params(kp, 1, 1, hidden, c),
            ))
            cin = c
    key, kh = jax.random.split(key)
    params["head"] = _conv_bn_params(kh, 1, 1, cin, 1280)        # 1x1 ConvBNReLU6
    return params


# ------------------------------- forward pass -------------------------------

def feature_extractor_forward(params, x_nchw):
    # Accepts NCHW (PyTorch convention); computes in NHWC internally.
    x = jnp.transpose(x_nchw, (0, 2, 3, 1)).astype(jnp.float32)
    x = stem_conv3x3_s2(x, params["stem"])
    for blk in params["blocks"]:
        if blk["stride"] == 1:
            x = fused_block_s1(x, blk)
        else:
            x = block_s2(x, blk)
    # head 1x1 ConvBNReLU6 (320 -> 1280) + adaptive average pool + flatten
    N, H, W, Cin = x.shape
    C = params["head"]["w"].shape[-1]
    y = matmul_bn_act(x.reshape(N * H * W, Cin), params["head"]["w"],
                      params["head"]["scale"], params["head"]["bias"],
                      relu6=True)
    if H * W == 1:
        return y.reshape(N, C)            # pooling over a 1x1 map is a view
    return global_avg_pool(y.reshape(N, H, W, C))


# ----------------------------------- main ------------------------------------

if __name__ == "__main__":
    key = jax.random.PRNGKey(0)
    kparam, kx = jax.random.split(key)
    params = init_feature_extractor_params(kparam)
    # NCHW input (batch=2, channels=3, 32x32 spatial -> 5 stride-2 stages -> 1x1)
    x = jax.random.normal(kx, (2, 3, 32, 32), jnp.float32)
    out = feature_extractor_forward(params, x)
    out = jax.block_until_ready(out)
    assert out.shape == (2, 1280), out.shape
    assert bool(jnp.all(jnp.isfinite(out)))
    print("KERNEL_OK")
</pallas_src>

<mosaic_0001>
module attributes {stable_mosaic.version = 11 : i64} {
  func.func @_mm_kernel(%arg0: i32, %arg1: memref<256x27xf32, #tpu.memory_space<vmem>>, %arg2: memref<27x32xbf16, #tpu.memory_space<vmem>>, %arg3: memref<1x32xf32, #tpu.memory_space<vmem>>, %arg4: memref<1x32xf32, #tpu.memory_space<vmem>>, %arg5: memref<256x32xf32, #tpu.memory_space<vmem>>) attributes {dimension_semantics = [#tpu.dimension_semantics<parallel>], iteration_bounds = array<i64: 2>, scalar_prefetch = 0 : i64, scratch_operands = 0 : i64, tpu.core_type = #tpu.core_type<tc>, window_params = [{transform_indices = @transform_0, window_bounds = array<i64: 256, 27>}, {pipeline_mode = #tpu.pipeline_mode<synchronous>, transform_indices = @transform_1, window_bounds = array<i64: 27, 32>}, {pipeline_mode = #tpu.pipeline_mode<synchronous>, transform_indices = @transform_2, window_bounds = array<i64: 1, 32>}, {pipeline_mode = #tpu.pipeline_mode<synchronous>, transform_indices = @transform_3, window_bounds = array<i64: 1, 32>}, {transform_indices = @transform_4, window_bounds = array<i64: 256, 32>}]} {
    %c0 = arith.constant 0 : index
    %c0_0 = arith.constant 0 : index
    %0 = vector.load %arg1[%c0, %c0_0] : memref<256x27xf32, #tpu.memory_space<vmem>>, vector<256x27xf32>
    %1 = arith.truncf %0 : vector<256x27xf32> to vector<256x27xbf16>
    %c0_1 = arith.constant 0 : index
    %c0_2 = arith.constant 0 : index
    %2 = vector.load %arg2[%c0_1, %c0_2] : memref<27x32xbf16, #tpu.memory_space<vmem>>, vector<27x32xbf16>
    %cst = arith.constant dense<0.000000e+00> : vector<256x32xf32>
    %3 = tpu.matmul %1, %2, %cst {dimension_numbers = #tpu.dot_dimension_numbers<[1], [0], [0], [1], [0, 0, 1, 1], [], []>} : vector<256x27xbf16>, vector<27x32xbf16>, vector<256x32xf32> -> vector<256x32xf32>
    %c0_3 = arith.constant 0 : index
    %c0_4 = arith.constant 0 : index
    %4 = vector.load %arg3[%c0_3, %c0_4] : memref<1x32xf32, #tpu.memory_space<vmem>>, vector<1x32xf32>
    %5 = vector.broadcast %4 : vector<1x32xf32> to vector<256x32xf32>
    %6 = arith.mulf %3, %5 : vector<256x32xf32>
    %c0_5 = arith.constant 0 : index
    %c0_6 = arith.constant 0 : index
    %7 = vector.load %arg4[%c0_5, %c0_6] : memref<1x32xf32, #tpu.memory_space<vmem>>, vector<1x32xf32>
    %8 = vector.broadcast %7 : vector<1x32xf32> to vector<256x32xf32>
    %9 = arith.addf %6, %8 : vector<256x32xf32>
    %cst_7 = arith.constant 0.000000e+00 : f32
    %cst_8 = arith.constant 6.000000e+00 : f32
    %10 = vector.broadcast %cst_7 : f32 to vector<256x32xf32>
    %11 = arith.maximumf %10, %9 : vector<256x32xf32>
    %12 = vector.broadcast %cst_8 : f32 to vector<256x32xf32>
    %13 = arith.minimumf %12, %11 : vector<256x32xf32>
    %c0_9 = arith.constant 0 : index
    %c0_10 = arith.constant 0 : index
    %14 = vector.load %arg5[%c0_9, %c0_10] : memref<256x32xf32, #tpu.memory_space<vmem>>, vector<256x32xf32>
    tpu.vector_store %arg5[%c0_9, %c0_10], %13 {strides = array<i32>} : memref<256x32xf32, #tpu.memory_space<vmem>>, vector<256x32xf32>,
    return
  }
  func.func @transform_0(%arg0: i32) -> (i32, i32) {
    %c0_i32 = arith.constant 0 : i32
    %c0_i32_0 = arith.constant 0 : i32
    return %arg0, %c0_i32 : i32, i32
  }
  func.func @transform_1(%arg0: i32) -> (i32, i32) {
    %c0_i32 = arith.constant 0 : i32
    %c0_i32_0 = arith.constant 0 : i32
    %c0_i32_1 = arith.constant 0 : i32
    return %c0_i32, %c0_i32_0 : i32, i32
  }
  func.func @transform_2(%arg0: i32) -> (i32, i32) {
    %c0_i32 = arith.constant 0 : i32
    %c0_i32_0 = arith.constant 0 : i32
    %c0_i32_1 = arith.constant 0 : i32
    return %c0_i32, %c0_i32_0 : i32, i32
  }
  func.func @transform_3(%arg0: i32) -> (i32, i32) {
    %c0_i32 = arith.constant 0 : i32
    %c0_i32_0 = arith.constant 0 : i32
    %c0_i32_1 = arith.constant 0 : i32
    return %c0_i32, %c0_i32_0 : i32, i32
  }
  func.func @transform_4(%arg0: i32) -> (i32, i32) {
    %c0_i32 = arith.constant 0 : i32
    %c0_i32_0 = arith.constant 0 : i32
    return %arg0, %c0_i32 : i32, i32
  }
}

</mosaic_0001>

<bundles_post_ra>
// kernel: tpu_custom_call.1
= control target key start
LH: loop header
LB: loop body
LE: loop exit
PB: predicated region body
PF: predicated region fallthrough
CT: control target
= control target key end

     0   :  { %s723_s15 = smov 0   ;;  %s946_s0 = inlined_call_operand.vmem [shape: f32[512,27], index: 0, kind: input, shape index: {}]   ;;  %s947_s1 = inlined_call_operand.vmem [shape: bf16[27,32], index: 1, kind: input, shape index: {}]   ;;  %s948_s2 = inlined_call_operand.vmem [shape: f32[1,32], index: 2, kind: input, shape index: {}]   ;;  %s949_s3 = inlined_call_operand.vmem [shape: f32[1,32], index: 3, kind: input, shape index: {}]   ;;  %s950_s4 = inlined_call_operand.vmem [shape: f32[512,32], index: 4, kind: output, shape index: {}]  }
   0x1 LB: > { %s635_s16 = sadd.s32 4294967295, %s695_s15   ;;  %p639_p0 = scmp.ge.s32.totalorder %s695_s15, 1  ;;  %s695_s15 = sphi %s723_s15, %s14_s15  }
   0x2   : > { %p163_p1 = scmp.lt.s32.totalorder %s695_s15, 3 }
   0x4   : > { %p164_p2 = pnand %p639_p0, %p163_p1 }
   0x5   : > { %s640_s21 = sshll.u32 (!%p164_p2), %s635_s16, 5 }
   0x6   : > { %167 = sbr.rel (%p164_p2) target bundleno = 223 (0xdf), region = 36  ;;  %p190_p3 = scmp.lt.s32.totalorder (!%p164_p2), %s640_s21, 63 }
   0xb   : > { %v650_v0 = vld [vmem:[%s947_s1 + $0x8] sm:$0xf]  ;;  %v671_v1 = vld [vmem:[%s947_s1 + $0x8] sm:$0x30]  ;;  %vm314_vm0 = vcmask 1044480   ;;  %vm315_vm1 = vcmask 1045504  }
   0xc   : > { %v651_v2 = vor.u32 %v671_v1, %v650_v0  ;;  %v697_v3 = vmov 65535   ;;  %s952_s21 = smov (!%p190_p3, %s640_s21), 63  ;;  %v670_v7 = vld [vmem:[%s947_s1] sm:$0xff]  ;;  %vm265_vm2 = vcmask 220160   ;;  %vm546_vm3 = vcmask 261120  }
   0xd   : > { %v316_v4 = vsel %vm314_vm0, 4294967295, %v697_v3  ;;  %s641_s24 = sshll.u32 %s952_s21, 3  ;;  %v801_v56 = vld [vmem:[%s948_s2] ss:$0 sm:$0xff] }
   0xe   : > { %v317_v5 = vsel %vm315_vm1, %v316_v4, 0  ;;  %s748_s27 = scalar_lea.vmem %s946_s0, %s641_s24  ;;  %v806_v57 = vld [vmem:[%s949_s3] ss:$0 sm:$0xff]  ;;  %s817_s8 = scalar_lea.vmem %s950_s4, %s641_s24 }
   0xf   : > { %v319_v6 = vand.u32 %v651_v2, %v317_v5  ;;  %v202_v8 = vld [vmem:[%s748_s27] sm:$0xff]  ;;  %v203_v9 = vld [vmem:[%s748_s27 + $0x8] sm:$0xff]  ;;  %v204_v20 = vld [vmem:[%s748_s27 + $0x10] sm:$0xff] }
  0x10   : > { %v210_v10 = vld [vmem:[%s748_s27 + $0x40] sm:$0xff]  ;;  %v234_v11 = vpack.c.bf16 %v203_v9, %v202_v8  ;;  %v211_v12 = vld [vmem:[%s748_s27 + $0x48] sm:$0xff]  ;;  %v205_v21 = vld [vmem:[%s748_s27 + $0x18] sm:$0xff] }
  0x11   : > { %327 = vmatpush.bf16.msra.mxu0 %v319_v6  ;;  %672 = vmatpush.bf16.msra.mxu1 %v319_v6  ;;  %v218_v13 = vld [vmem:[%s748_s27 + $0x80] sm:$0xff]  ;;  %v219_v14 = vld [vmem:[%s748_s27 + $0x88] sm:$0xff]  ;;  %v238_v15 = vpack.c.bf16 %v211_v12, %v210_v10  ;;  %v212_v22 = vld [vmem:[%s748_s27 + $0x50] sm:$0xff]  ;;  %v235_v28 = vpack.c.bf16 %v205_v21, %v204_v20 }
  0x12   : > { %673 = vmatpush.bf16.msra.mxu2 %v319_v6  ;;  %674 = vmatpush.bf16.msra.mxu3 %v319_v6  ;;  %v242_v16 = vpack.c.bf16 %v219_v14, %v218_v13  ;;  %v226_v17 = vld [vmem:[%s748_s27 + $0xc0] sm:$0xff]  ;;  %v227_v18 = vld [vmem:[%s748_s27 + $0xc8] sm:$0xff]  ;;  %v213_v23 = vld [vmem:[%s748_s27 + $0x58] sm:$0xff] }
  0x13   : > { %v246_v19 = vpack.c.bf16 %v227_v18, %v226_v17  ;;  %v220_v24 = vld [vmem:[%s748_s27 + $0x90] sm:$0xff]  ;;  %v221_v25 = vld [vmem:[%s748_s27 + $0x98] sm:$0xff]  ;;  %v239_v29 = vpack.c.bf16 %v213_v23, %v212_v22  ;;  %v206_v32 = vld [vmem:[%s748_s27 + $0x20] sm:$0xff] }
  0x14   : > { %v228_v26 = vld [vmem:[%s748_s27 + $0xd0] sm:$0xff]  ;;  %v229_v27 = vld [vmem:[%s748_s27 + $0xd8] sm:$0xff]  ;;  %v243_v30 = vpack.c.bf16 %v221_v25, %v220_v24  ;;  %v207_v33 = vld [vmem:[%s748_s27 + $0x28] sm:$0xff] }
  0x15   : > { %328 = vmatpush.bf16.msra.mxu0 %v670_v7  ;;  %675 = vmatpush.bf16.msra.mxu1 %v670_v7  ;;  %v247_v31 = vpack.c.bf16 %v229_v27, %v228_v26  ;;  %v214_v34 = vld [vmem:[%s748_s27 + $0x60] sm:$0xff]  ;;  %v215_v35 = vld [vmem:[%s748_s27 + $0x68] sm:$0xff]  ;;  %v236_v40 = vpack.c.bf16 %v207_v33, %v206_v32  ;;  %v208_v44 = vld [vmem:[%s748_s27 + $0x30] sm:$0xff] }
  0x16   : > { %676 = vmatpush.bf16.msra.mxu2 %v670_v7  ;;  %677 = vmatpush.bf16.msra.mxu3 %v670_v7  ;;  %v222_v36 = vld [vmem:[%s748_s27 + $0xa0] sm:$0xff]  ;;  %v223_v37 = vld [vmem:[%s748_s27 + $0xa8] sm:$0xff]  ;;  %v240_v41 = vpack.c.bf16 %v215_v35, %v214_v34  ;;  %v209_v45 = vld [vmem:[%s748_s27 + $0x38] sm:$0xff] }
  0x17   : > { %v230_v38 = vld [vmem:[%s748_s27 + $0xe0] sm:$0xff]  ;;  %v231_v39 = vld [vmem:[%s748_s27 + $0xe8] sm:$0xff]  ;;  %v244_v42 = vpack.c.bf16 %v223_v37, %v222_v36  ;;  %v216_v46 = vld [vmem:[%s748_s27 + $0x70] sm:$0xff]  ;;  %v237_v52 = vpack.c.bf16 %v209_v45, %v208_v44 }
  0x18   : > { %652 = vmatmul.msk.bf16.vlgmr.msra.gmra.mxu0 %vm265_vm2, %v234_v11  ;;  %656 = vmatmul.msk.bf16.vlgmr.msra.gmra.mxu1 %vm265_vm2, %v238_v15  ;;  %v248_v43 = vpack.c.bf16 %v231_v39, %v230_v38  ;;  %v217_v47 = vld [vmem:[%s748_s27 + $0x78] sm:$0xff]  ;;  %v224_v48 = vld [vmem:[%s748_s27 + $0xb0] sm:$0xff] }
  0x19   : > { %660 = vmatmul.msk.bf16.vlgmr.msra.gmra.mxu2 %vm265_vm2, %v242_v16  ;;  %664 = vmatmul.msk.bf16.vlgmr.msra.gmra.mxu3 %vm265_vm2, %v246_v19  ;;  %v225_v49 = vld [vmem:[%s748_s27 + $0xb8] sm:$0xff]  ;;  %v232_v50 = vld [vmem:[%s748_s27 + $0xf0] sm:$0xff]  ;;  %v241_v53 = vpack.c.bf16 %v217_v47, %v216_v46 }
  0x1a   : > { %v233_v51 = vld [vmem:[%s748_s27 + $0xf8] sm:$0xff]  ;;  %v245_v54 = vpack.c.bf16 %v225_v49, %v224_v48 }
  0x1b   : > { %v249_v55 = vpack.c.bf16 %v233_v51, %v232_v50 }
  0x28   : > { %653 = vmatmul.msk.bf16.gmra.mxu0 %vm265_vm2, %v235_v28  ;;  %657 = vmatmul.msk.bf16.gmra.mxu1 %vm265_vm2, %v239_v29 }
  0x29   : > { %661 = vmatmul.msk.bf16.gmra.mxu2 %vm265_vm2, %v243_v30  ;;  %665 = vmatmul.msk.bf16.gmra.mxu3 %vm265_vm2, %v247_v31 }
  0x38   : > { %654 = vmatmul.msk.bf16.gmra.mxu0 %vm265_vm2, %v236_v40  ;;  %658 = vmatmul.msk.bf16.gmra.mxu1 %vm265_vm2, %v240_v41 }
  0x39   : > { %662 = vmatmul.msk.bf16.gmra.mxu2 %vm265_vm2, %v244_v42  ;;  %666 = vmatmul.msk.bf16.gmra.mxu3 %vm265_vm2, %v248_v43 }
  0x48   : > { %655 = vmatmul.msk.bf16.gmra.mxu0 %vm265_vm2, %v237_v52  ;;  %659 = vmatmul.msk.bf16.gmra.mxu1 %vm265_vm2, %v241_v53 }
  0x49   : > { %663 = vmatmul.msk.bf16.gmra.mxu2 %vm265_vm2, %v245_v54  ;;  %667 = vmatmul.msk.bf16.gmra.mxu3 %vm265_vm2, %v249_v55 }
  0x95   : > { %v330_v58 = vpop.f32.mrf.mxu0  ;;  %v350_v59 = vpop.f32.mrf.mxu1 }
  0x96   : > { %v414_v60 = vmul.f32 %v801_v56, %v330_v58  ;;  %v422_v61 = vmul.f32 %v801_v56, %v350_v59 }
  0x98   : > { %v450_v62 = vadd.f32 %v806_v57, %v414_v60  ;;  %v458_v63 = vadd.f32 %v806_v57, %v422_v61 }
  0x9a   : > { %v482_v0 = vmax.f32 %v450_v62, 0.0  ;;  %v490_v1 = vmax.f32 %v458_v63, 0.0 }
  0x9c   : > { %v514_v2 = vmin.f32 %v482_v0, 6.0  ;;  %v522_v3 = vmin.f32 %v490_v1, 6.0  ;;  %v370_v4 = vpop.f32.mrf.mxu2  ;;  %v390_v5 = vpop.f32.mrf.mxu3 }
  0x9d   : > { %v430_v6 = vmul.f32 %v801_v56, %v370_v4  ;;  %v438_v7 = vmul.f32 %v801_v56, %v390_v5  ;;  %v332_v8 = vpop.f32.mrf.mxu0  ;;  %v352_v9 = vpop.f32.mrf.mxu1 }
  0x9e   : > { %547 = vst.msk [vmem:[%s817_s8] sm:$0xff] %vm546_vm3, %v514_v2  ;;  %v415_v10 = vmul.f32 %v801_v56, %v332_v8  ;;  %v423_v11 = vmul.f32 %v801_v56, %v352_v9 }
  0x9f   : > { %555 = vst.msk [vmem:[%s817_s8 + $0x40] sm:$0xff] %vm546_vm3, %v522_v3  ;;  %v466_v12 = vadd.f32 %v806_v57, %v430_v6  ;;  %v474_v13 = vadd.f32 %v806_v57, %v438_v7 }
  0xa0   : > { %v451_v14 = vadd.f32 %v806_v57, %v415_v10  ;;  %v459_v15 = vadd.f32 %v806_v57, %v423_v11 }
  0xa1   : > { %v498_v16 = vmax.f32 %v466_v12, 0.0  ;;  %v506_v17 = vmax.f32 %v474_v13, 0.0 }
  0xa2   : > { %v483_v18 = vmax.f32 %v451_v14, 0.0  ;;  %v491_v19 = vmax.f32 %v459_v15, 0.0 }
  0xa3   : > { %v530_v20 = vmin.f32 %v498_v16, 6.0  ;;  %v538_v21 = vmin.f32 %v506_v17, 6.0 }
  0xa4   : > { %v515_v22 = vmin.f32 %v483_v18, 6.0  ;;  %v523_v23 = vmin.f32 %v491_v19, 6.0  ;;  %v372_v24 = vpop.f32.mrf.mxu2  ;;  %v392_v25 = vpop.f32.mrf.mxu3 }
  0xa5   : > { %563 = vst.msk [vmem:[%s817_s8 + $0x80] sm:$0xff] %vm546_vm3, %v530_v20  ;;  %v431_v26 = vmul.f32 %v801_v56, %v372_v24  ;;  %v439_v27 = vmul.f32 %v801_v56, %v392_v25  ;;  %v335_v28 = vpop.f32.mrf.mxu0  ;;  %v355_v29 = vpop.f32.mrf.mxu1 }
  0xa6   : > { %571 = vst.msk [vmem:[%s817_s8 + $0xc0] sm:$0xff] %vm546_vm3, %v538_v21  ;;  %v416_v30 = vmul.f32 %v801_v56, %v335_v28  ;;  %v424_v31 = vmul.f32 %v801_v56, %v355_v29 }
  0xa7   : > { %548 = vst.msk [vmem:[%s817_s8 + $0x8] sm:$0xff] %vm546_vm3, %v515_v22  ;;  %v467_v32 = vadd.f32 %v806_v57, %v431_v26  ;;  %v475_v33 = vadd.f32 %v806_v57, %v439_v27 }
  0xa8   : > { %556 = vst.msk [vmem:[%s817_s8 + $0x48] sm:$0xff] %vm546_vm3, %v523_v23  ;;  %v452_v34 = vadd.f32 %v806_v57, %v416_v30  ;;  %v460_v35 = vadd.f32 %v806_v57, %v424_v31 }
  0xa9   : > { %v499_v36 = vmax.f32 %v467_v32, 0.0  ;;  %v507_v37 = vmax.f32 %v475_v33, 0.0 }
  0xaa   : > { %v484_v38 = vmax.f32 %v452_v34, 0.0  ;;  %v492_v39 = vmax.f32 %v460_v35, 0.0 }
  0xab   : > { %v531_v40 = vmin.f32 %v499_v36, 6.0  ;;  %v539_v41 = vmin.f32 %v507_v37, 6.0 }
  0xac   : > { %v516_v42 = vmin.f32 %v484_v38, 6.0  ;;  %v524_v43 = vmin.f32 %v492_v39, 6.0  ;;  %v375_v44 = vpop.f32.mrf.mxu2  ;;  %v395_v45 = vpop.f32.mrf.mxu3 }
  0xad   : > { %564 = vst.msk [vmem:[%s817_s8 + $0x88] sm:$0xff] %vm546_vm3, %v531_v40  ;;  %v432_v46 = vmul.f32 %v801_v56, %v375_v44  ;;  %v440_v47 = vmul.f32 %v801_v56, %v395_v45  ;;  %v337_v48 = vpop.f32.mrf.mxu0  ;;  %v357_v49 = vpop.f32.mrf.mxu1 }
  0xae   : > { %572 = vst.msk [vmem:[%s817_s8 + $0xc8] sm:$0xff] %vm546_vm3, %v539_v41  ;;  %v417_v50 = vmul.f32 %v801_v56, %v337_v48  ;;  %v425_v51 = vmul.f32 %v801_v56, %v357_v49 }
  0xaf   : > { %549 = vst.msk [vmem:[%s817_s8 + $0x10] sm:$0xff] %vm546_vm3, %v516_v42  ;;  %v468_v52 = vadd.f32 %v806_v57, %v432_v46  ;;  %v476_v53 = vadd.f32 %v806_v57, %v440_v47 }
  0xb0   : > { %557 = vst.msk [vmem:[%s817_s8 + $0x50] sm:$0xff] %vm546_vm3, %v524_v43  ;;  %v453_v54 = vadd.f32 %v806_v57, %v417_v50  ;;  %v461_v55 = vadd.f32 %v806_v57, %v425_v51 }
  0xb1   : > { %v500_v58 = vmax.f32 %v468_v52, 0.0  ;;  %v508_v59 = vmax.f32 %v476_v53, 0.0 }
  0xb2   : > { %v485_v60 = vmax.f32 %v453_v54, 0.0  ;;  %v493_v61 = vmax.f32 %v461_v55, 0.0 }
  0xb3   : > { %v532_v62 = vmin.f32 %v500_v58, 6.0  ;;  %v540_v63 = vmin.f32 %v508_v59, 6.0 }
  0xb4   : > { %v517_v0 = vmin.f32 %v485_v60, 6.0  ;;  %v525_v1 = vmin.f32 %v493_v61, 6.0  ;;  %v377_v2 = vpop.f32.mrf.mxu2  ;;  %v397_v3 = vpop.f32.mrf.mxu3 }
  0xb5   : > { %565 = vst.msk [vmem:[%s817_s8 + $0x90] sm:$0xff] %vm546_vm3, %v532_v62  ;;  %v433_v4 = vmul.f32 %v801_v56, %v377_v2  ;;  %v441_v5 = vmul.f32 %v801_v56, %v397_v3  ;;  %v340_v6 = vpop.f32.mrf.mxu0  ;;  %v360_v7 = vpop.f32.mrf.mxu1 }
  0xb6   : > { %573 = vst.msk [vmem:[%s817_s8 + $0xd0] sm:$0xff] %vm546_vm3, %v540_v63  ;;  %v418_v8 = vmul.f32 %v801_v56, %v340_v6  ;;  %v426_v9 = vmul.f32 %v801_v56, %v360_v7 }
  0xb7   : > { %550 = vst.msk [vmem:[%s817_s8 + $0x18] sm:$0xff] %vm546_vm3, %v517_v0  ;;  %v469_v10 = vadd.f32 %v806_v57, %v433_v4  ;;  %v477_v11 = vadd.f32 %v806_v57, %v441_v5 }
  0xb8   : > { %558 = vst.msk [vmem:[%s817_s8 + $0x58] sm:$0xff] %vm546_vm3, %v525_v1  ;;  %v454_v12 = vadd.f32 %v806_v57, %v418_v8  ;;  %v462_v13 = vadd.f32 %v806_v57, %v426_v9 }
  0xb9   : > { %v501_v14 = vmax.f32 %v469_v10, 0.0  ;;  %v509_v15 = vmax.f32 %v477_v11, 0.0 }
  0xba   : > { %v486_v16 = vmax.f32 %v454_v12, 0.0  ;;  %v494_v17 = vmax.f32 %v462_v13, 0.0 }
  0xbb   : > { %v533_v18 = vmin.f32 %v501_v14, 6.0  ;;  %v541_v19 = vmin.f32 %v509_v15, 6.0 }
  0xbc   : > { %v518_v20 = vmin.f32 %v486_v16, 6.0  ;;  %v526_v21 = vmin.f32 %v494_v17, 6.0  ;;  %v380_v22 = vpop.f32.mrf.mxu2  ;;  %v400_v23 = vpop.f32.mrf.mxu3 }
  0xbd   : > { %566 = vst.msk [vmem:[%s817_s8 + $0x98] sm:$0xff] %vm546_vm3, %v533_v18  ;;  %v434_v24 = vmul.f32 %v801_v56, %v380_v22  ;;  %v442_v25 = vmul.f32 %v801_v56, %v400_v23  ;;  %v342_v26 = vpop.f32.mrf.mxu0  ;;  %v362_v27 = vpop.f32.mrf.mxu1 }
  0xbe   : > { %574 = vst.msk [vmem:[%s817_s8 + $0xd8] sm:$0xff] %vm546_vm3, %v541_v19  ;;  %v419_v28 = vmul.f32 %v801_v56, %v342_v26  ;;  %v427_v29 = vmul.f32 %v801_v56, %v362_v27 }
  0xbf   : > { %551 = vst.msk [vmem:[%s817_s8 + $0x20] sm:$0xff] %vm546_vm3, %v518_v20  ;;  %v470_v30 = vadd.f32 %v806_v57, %v434_v24  ;;  %v478_v31 = vadd.f32 %v806_v57, %v442_v25 }
  0xc0   : > { %559 = vst.msk [vmem:[%s817_s8 + $0x60] sm:$0xff] %vm546_vm3, %v526_v21  ;;  %v455_v32 = vadd.f32 %v806_v57, %v419_v28  ;;  %v463_v33 = vadd.f32 %v806_v57, %v427_v29 }
  0xc1   : > { %v502_v34 = vmax.f32 %v470_v30, 0.0  ;;  %v510_v35 = vmax.f32 %v478_v31, 0.0 }
  0xc2   : > { %v487_v36 = vmax.f32 %v455_v32, 0.0  ;;  %v495_v37 = vmax.f32 %v463_v33, 0.0 }
  0xc3   : > { %v534_v38 = vmin.f32 %v502_v34, 6.0  ;;  %v542_v39 = vmin.f32 %v510_v35, 6.0 }
  0xc4   : > { %v519_v40 = vmin.f32 %v487_v36, 6.0  ;;  %v527_v41 = vmin.f32 %v495_v37, 6.0  ;;  %v382_v42 = vpop.f32.mrf.mxu2  ;;  %v402_v43 = vpop.f32.mrf.mxu3 }
  0xc5   : > { %567 = vst.msk [vmem:[%s817_s8 + $0xa0] sm:$0xff] %vm546_vm3, %v534_v38  ;;  %v435_v44 = vmul.f32 %v801_v56, %v382_v42  ;;  %v443_v45 = vmul.f32 %v801_v56, %v402_v43  ;;  %v345_v46 = vpop.f32.mrf.mxu0  ;;  %v365_v47 = vpop.f32.mrf.mxu1 }
  0xc6   : > { %575 = vst.msk [vmem:[%s817_s8 + $0xe0] sm:$0xff] %vm546_vm3, %v542_v39  ;;  %v420_v48 = vmul.f32 %v801_v56, %v345_v46  ;;  %v428_v49 = vmul.f32 %v801_v56, %v365_v47 }
  0xc7   : > { %552 = vst.msk [vmem:[%s817_s8 + $0x28] sm:$0xff] %vm546_vm3, %v519_v40  ;;  %v471_v50 = vadd.f32 %v806_v57, %v435_v44  ;;  %v479_v51 = vadd.f32 %v806_v57, %v443_v45 }
  0xc8   : > { %560 = vst.msk [vmem:[%s817_s8 + $0x68] sm:$0xff] %vm546_vm3, %v527_v41  ;;  %v456_v52 = vadd.f32 %v806_v57, %v420_v48  ;;  %v464_v53 = vadd.f32 %v806_v57, %v428_v49 }
  0xc9   : > { %v503_v54 = vmax.f32 %v471_v50, 0.0  ;;  %v511_v55 = vmax.f32 %v479_v51, 0.0 }
  0xca   : > { %v488_v58 = vmax.f32 %v456_v52, 0.0  ;;  %v496_v59 = vmax.f32 %v464_v53, 0.0 }
  0xcb   : > { %v535_v60 = vmin.f32 %v503_v54, 6.0  ;;  %v543_v61 = vmin.f32 %v511_v55, 6.0 }
  0xcc   : > { %v520_v62 = vmin.f32 %v488_v58, 6.0  ;;  %v528_v63 = vmin.f32 %v496_v59, 6.0  ;;  %v385_v0 = vpop.f32.mrf.mxu2  ;;  %v405_v1 = vpop.f32.mrf.mxu3 }
  0xcd   : > { %568 = vst.msk [vmem:[%s817_s8 + $0xa8] sm:$0xff] %vm546_vm3, %v535_v60  ;;  %v436_v2 = vmul.f32 %v801_v56, %v385_v0  ;;  %v444_v3 = vmul.f32 %v801_v56, %v405_v1  ;;  %v347_v4 = vpop.f32.mrf.mxu0  ;;  %v367_v5 = vpop.f32.mrf.mxu1 }
  0xce   : > { %576 = vst.msk [vmem:[%s817_s8 + $0xe8] sm:$0xff] %vm546_vm3, %v543_v61  ;;  %v421_v6 = vmul.f32 %v801_v56, %v347_v4  ;;  %v429_v7 = vmul.f32 %v801_v56, %v367_v5 }
  0xcf   : > { %553 = vst.msk [vmem:[%s817_s8 + $0x30] sm:$0xff] %vm546_vm3, %v520_v62  ;;  %v472_v8 = vadd.f32 %v806_v57, %v436_v2  ;;  %v480_v9 = vadd.f32 %v806_v57, %v444_v3 }
  0xd0   : > { %561 = vst.msk [vmem:[%s817_s8 + $0x70] sm:$0xff] %vm546_vm3, %v528_v63  ;;  %v457_v10 = vadd.f32 %v806_v57, %v421_v6  ;;  %v465_v11 = vadd.f32 %v806_v57, %v429_v7 }
  0xd1   : > { %v504_v12 = vmax.f32 %v472_v8, 0.0  ;;  %v512_v13 = vmax.f32 %v480_v9, 0.0 }
  0xd2   : > { %v489_v14 = vmax.f32 %v457_v10, 0.0  ;;  %v497_v15 = vmax.f32 %v465_v11, 0.0 }
  0xd3   : > { %v536_v16 = vmin.f32 %v504_v12, 6.0  ;;  %v544_v17 = vmin.f32 %v512_v13, 6.0 }
  0xd4   : > { %v521_v18 = vmin.f32 %v489_v14, 6.0  ;;  %v529_v19 = vmin.f32 %v497_v15, 6.0  ;;  %v387_v20 = vpop.f32.mrf.mxu2  ;;  %v407_v21 = vpop.f32.mrf.mxu3 }
  0xd5   : > { %569 = vst.msk [vmem:[%s817_s8 + $0xb0] sm:$0xff] %vm546_vm3, %v536_v16  ;;  %v437_v22 = vmul.f32 %v801_v56, %v387_v20  ;;  %v445_v23 = vmul.f32 %v801_v56, %v407_v21 }
  0xd6   : > { %577 = vst.msk [vmem:[%s817_s8 + $0xf0] sm:$0xff] %vm546_vm3, %v544_v17 }
  0xd7   : > { %554 = vst.msk [vmem:[%s817_s8 + $0x38] sm:$0xff] %vm546_vm3, %v521_v18  ;;  %v473_v24 = vadd.f32 %v806_v57, %v437_v22  ;;  %v481_v25 = vadd.f32 %v806_v57, %v445_v23 }
  0xd8   : > { %562 = vst.msk [vmem:[%s817_s8 + $0x78] sm:$0xff] %vm546_vm3, %v529_v19 }
  0xd9   : > { %v505_v26 = vmax.f32 %v473_v24, 0.0  ;;  %v513_v27 = vmax.f32 %v481_v25, 0.0 }
  0xdb   : > { %v537_v28 = vmin.f32 %v505_v26, 6.0  ;;  %v545_v29 = vmin.f32 %v513_v27, 6.0 }
  0xdd   : > { %570 = vst.msk [vmem:[%s817_s8 + $0xb8] sm:$0xff] %vm546_vm3, %v537_v28 }
  0xde   : > { %578 = vst.msk [vmem:[%s817_s8 + $0xf8] sm:$0xff] %vm546_vm3, %v545_v29 }
  0xdf PF: > { %s14_s15 = sadd.s32 1, %s695_s15  }
  0xe0   : > { %p11_p4 = scmp.ge.s32.totalorder %s14_s15, 4  }
  0xe2   :  { %13 = sbr.rel (!%p11_p4) target bundleno = 1 (0x1), region = 66 }

</bundles_post_ra>
